<compile_context>
chip_gen: v7x
topology: tpu7x:2x2x1
jax: 0.10.0
libtpu: 0.0.40
codegen_flags: <defaults>
</compile_context>

<pallas_src>
import functools

import jax
import jax.numpy as jnp
from jax.experimental import pallas as pl
from jax.experimental.pallas import tpu as pltpu


def _round_up(x, m):
    return (x + m - 1) // m * m


# ---------------------------------------------------------------------------
# Kernel
# ---------------------------------------------------------------------------
def _raven_kernel(emb_ref, vqT_ref, wenc_ref, benc_ref, vmask_ref,
                  logits_ref, loss_ref):
    """Per-token-tile fused encoder -> tied-codebook decoder -> CE loss."""
    emb_bf = emb_ref[...]                               # (TT, Ep) bf16 (gathered in wrapper)
    emb = emb_bf.astype(jnp.float32)                    # (TT, Ep) f32

    # --- encoder_head: memory = relu(emb @ W_enc + b_enc) ---
    mem = jnp.dot(emb_bf, wenc_ref[...],
                  preferred_element_type=jnp.float32)   # (TT, Ep) f32
    mem = jnp.maximum(mem + benc_ref[...], 0.0)

    # --- decoder_head: tied-codebook projection, canonical (TT,E)x(E,V) dot ---
    dec = (emb + mem).astype(jnp.bfloat16)              # (TT, Ep) bf16
    logits = jnp.dot(dec, vqT_ref[...],
                     preferred_element_type=jnp.float32)  # (TT, Vp) f32
    logits_ref[...] = logits.astype(logits_ref.dtype)

    # --- loss_head: per-token softmax cross-entropy over the real vocab ---
    # Padded vocab columns are knocked out by a precomputed additive mask row.
    masked = logits + vmask_ref[...]                    # (TT, Vp)
    m = jnp.max(masked, axis=-1, keepdims=True)         # (TT, 1)
    lse = m + jnp.log(jnp.sum(jnp.exp(masked - m), axis=-1, keepdims=True))
    # Targets == input ids, so the gold logit is the rowwise dot of the decoder
    # activation with the token's own codebook embedding (E-length reduce,
    # V/E x cheaper than selecting from the logits row).
    gold = jnp.sum(dec.astype(jnp.float32) * emb, axis=-1, keepdims=True)
    loss_ref[...] = lse - gold                          # (TT, 1) column store


# ---------------------------------------------------------------------------
# VMEM / tile sizing (per TPU generation)
# ---------------------------------------------------------------------------
def _vmem_budget_bytes():
    """Working VMEM budget derived from the detected part (64 MiB fallback)."""
    try:
        cap = int(pltpu.get_tpu_info().vmem_capacity_bytes)
    except Exception:
        cap = 64 * 1024 * 1024  # safe floor: v7x has 64 MiB per TensorCore
    if cap <= 64 * 1024 * 1024:          # v7x-class: leave ~8 MiB headroom
        return max(cap - 8 * 1024 * 1024, 32 * 1024 * 1024)
    return int(0.75 * cap)               # v5e / v6e: 128 MiB parts


def _kernel_vmem_estimate(tt, v_pad, e_pad, logits_itemsize):
    bf16, f32 = 2, 4
    # Single-buffered residents (constant index_map, pl.Buffered(1)).
    resident = (e_pad * v_pad * bf16          # codebook^T
                + e_pad * e_pad * bf16        # encoder weight
                + 8 * e_pad * f32             # bias row (sublane-padded)
                + 8 * v_pad * f32)            # vocab mask row (sublane-padded)
    # Double-buffered streaming I/O.
    streamed = 2 * (tt * e_pad * bf16                   # seq_emb tile in
                    + tt * v_pad * logits_itemsize      # logits tile out
                    + tt * 128 * f32)                   # loss column (lane-padded)
    # Live f32 intermediates inside the body.
    scratch = 3 * tt * v_pad * f32 + 4 * tt * e_pad * f32
    return resident + streamed + scratch


def _choose_token_tile(num_tokens, v_pad, e_pad, logits_itemsize, budget):
    """Largest VMEM-fitting tile, preferring >= 2 tiles (v7x megacore)."""
    candidates = (512, 384, 256, 128, 64, 32, 16)
    fitting = [tt for tt in candidates
               if 1.25 * _kernel_vmem_estimate(tt, v_pad, e_pad,
                                               logits_itemsize) <= budget]
    if not fitting:
        return 16
    for tt in fitting:                 # largest tile still yielding >= 2 tiles
        if tt < num_tokens:
            return tt
    return fitting[-1]                 # tiny inputs: one tile is all there is


def _vmem_limit_bytes(tt, v_pad, e_pad, logits_itemsize, budget):
    est = int(1.25 * _kernel_vmem_estimate(tt, v_pad, e_pad, logits_itemsize))
    return int(min(max(est, 32 * 1024 * 1024), budget))


# ---------------------------------------------------------------------------
# Wrapper (RavenSolver.forward)
# ---------------------------------------------------------------------------
def raven_solver_forward(sequence, negative, vq_embed, w_enc, b_enc, *,
                         token_tile=None, logits_dtype=jnp.float32):
    """JAX wrapper reproducing RavenSolver.forward with synthetic heads.

    sequence, negative: (B, L) int32 token ids.
    Returns (loss_scalar, (logits[B, L, V], per_token_loss[B, L])).
    logits_dtype: pass jnp.bfloat16 on v5e to halve the dominant HBM writeback.
    """
    del negative  # TODO(synk): negatives unused (loss_head spec not provided).
    B, L = sequence.shape
    V, E = vq_embed.shape
    T = B * L

    V_pad = _round_up(max(V, 128), 128)
    E_pad = _round_up(max(E, 128), 128)
    logits_itemsize = jnp.dtype(logits_dtype).itemsize

    budget = _vmem_budget_bytes()
    TT = token_tile or _choose_token_tile(T, V_pad, E_pad, logits_itemsize,
                                          budget)
    T_pad = _round_up(T, TT)
    num_tiles = T_pad // TT

    # encode_code in the wrapper: plain embedding lookup, cast to bf16 so the
    # in-kernel matmuls run on the MXU's peak bf16 path (f32 accumulation).
    ids = sequence.reshape(T)
    vq_b = vq_embed.astype(jnp.bfloat16)
    seq_emb = jnp.pad(vq_b[ids], ((0, T_pad - T), (0, E_pad - E)))      # (Tp, Ep)
    vqT = jnp.pad(vq_b.T, ((0, E_pad - E), (0, V_pad - V)))             # (Ep, Vp)
    w_p = jnp.pad(w_enc.astype(jnp.bfloat16),
                  ((0, E_pad - E), (0, E_pad - E)))                     # (Ep, Ep)
    b_p = jnp.pad(b_enc.astype(jnp.float32).reshape(1, E),
                  ((0, 0), (0, E_pad - E)))                             # (1, Ep)
    vmask = jnp.where(jnp.arange(V_pad) < V, 0.0, -1e30).astype(
        jnp.float32).reshape(1, V_pad)                                  # (1, Vp)

    resident = dict(pipeline_mode=pl.Buffered(1))  # constant-index blocks: 1 buffer
    grid_spec = pltpu.PrefetchScalarGridSpec(
        num_scalar_prefetch=0,
        grid=(num_tiles,),
        in_specs=[
            pl.BlockSpec((TT, E_pad), lambda i: (i, 0)),                 # seq_emb tile
            pl.BlockSpec((E_pad, V_pad), lambda i: (0, 0), **resident),  # codebook^T
            pl.BlockSpec((E_pad, E_pad), lambda i: (0, 0), **resident),  # encoder weight
            pl.BlockSpec((1, E_pad), lambda i: (0, 0), **resident),      # encoder bias
            pl.BlockSpec((1, V_pad), lambda i: (0, 0), **resident),      # vocab mask row
        ],
        out_specs=[
            pl.BlockSpec((TT, V_pad), lambda i: (i, 0)),                 # logits
            pl.BlockSpec((TT, 1), lambda i: (i, 0)),                     # per-token loss
        ],
    )

    logits_p, loss_p = pl.pallas_call(
        _raven_kernel,
        grid_spec=grid_spec,
        out_shape=(
            jax.ShapeDtypeStruct((T_pad, V_pad), logits_dtype),
            jax.ShapeDtypeStruct((T_pad, 1), jnp.float32),
        ),
        compiler_params=pltpu.CompilerParams(
            # Token tiles are independent: v7x megacore shards this axis.
            dimension_semantics=("parallel",),
            vmem_limit_bytes=_vmem_limit_bytes(TT, V_pad, E_pad,
                                               logits_itemsize, budget)),
    )(seq_emb, vqT, w_p, b_p, vmask)

    logits = logits_p[:T, :V].reshape(B, L, V)
    per_token_loss = loss_p[:T, 0].reshape(B, L)
    loss = jnp.mean(per_token_loss)
    return loss, (logits, per_token_loss)


# ---------------------------------------------------------------------------
# Pure-JAX reference (same bf16-weight / f32-accum precision)
# ---------------------------------------------------------------------------
def _reference_forward(sequence, vq_embed, w_enc, b_enc):
    B, L = sequence.shape
    vq_b = vq_embed.astype(jnp.bfloat16)
    w_b = w_enc.astype(jnp.bfloat16)
    ids = sequence.reshape(-1)
    emb_b = vq_b[ids]                                              # (T, E) bf16
    emb = emb_b.astype(jnp.float32)
    mem = jnp.maximum(
        jnp.dot(emb_b, w_b, preferred_element_type=jnp.float32)
        + b_enc.astype(jnp.float32), 0.0)
    dec = (emb + mem).astype(jnp.bfloat16)
    logits = jnp.dot(dec, vq_b.T, preferred_element_type=jnp.float32)  # (T, V)
    lse = jax.scipy.special.logsumexp(logits, axis=-1)
    gold = jnp.take_along_axis(logits, ids[:, None], axis=-1)[:, 0]
    per_tok = (lse - gold).reshape(B, L)
    return jnp.mean(per_tok), logits.reshape(B, L, -1), per_tok


if __name__ == "__main__":
    key = jax.random.PRNGKey(0)
    k_seq, k_neg, k_vq, k_w, k_b = jax.random.split(key, 5)

    B, L = 2, 8          # batch, sequence length of discrete VQ tokens
    V, E = 64, 32        # codebook size, embedding dim

    sequence = jax.random.randint(k_seq, (B, L), 0, V, dtype=jnp.int32)
    negative = jax.random.randint(k_neg, (B, L), 0, V, dtype=jnp.int32)

    # Deterministic synthetic parameters (shapes implied by the module).
    vq_embed = jax.random.normal(k_vq, (V, E), dtype=jnp.float32) * 0.1
    w_enc = jax.random.normal(k_w, (E, E), dtype=jnp.float32) * 0.1
    b_enc = jax.random.normal(k_b, (1, E), dtype=jnp.float32) * 0.01

    loss, (logits, per_tok) = raven_solver_forward(
        sequence, negative, vq_embed, w_enc, b_enc)
    jax.block_until_ready((loss, logits, per_tok))

    ref_loss, ref_logits, ref_per_tok = _reference_forward(
        sequence, vq_embed, w_enc, b_enc)

    assert jnp.allclose(logits.astype(jnp.float32), ref_logits,
                        atol=5e-3, rtol=5e-3)
    assert jnp.allclose(per_tok, ref_per_tok, atol=5e-3, rtol=5e-3)
    assert jnp.allclose(loss, ref_loss, atol=2e-3, rtol=2e-3)

    print("KERNEL_OK")
</pallas_src>

<mosaic_0001>
module attributes {stable_mosaic.version = 11 : i64} {
  func.func @_raven_kernel(%arg0: i32, %arg1: memref<16x128xbf16, #tpu.memory_space<vmem>>, %arg2: memref<128x128xbf16, #tpu.memory_space<vmem>>, %arg3: memref<128x128xbf16, #tpu.memory_space<vmem>>, %arg4: memref<1x128xf32, #tpu.memory_space<vmem>>, %arg5: memref<1x128xf32, #tpu.memory_space<vmem>>, %arg6: memref<16x128xf32, #tpu.memory_space<vmem>>, %arg7: memref<16x1xf32, #tpu.memory_space<vmem>>) attributes {dimension_semantics = [#tpu.dimension_semantics<parallel>], iteration_bounds = array<i64: 1>, scalar_prefetch = 0 : i64, scratch_operands = 0 : i64, tpu.core_type = #tpu.core_type<tc>, window_params = [{transform_indices = @transform_0, window_bounds = array<i64: 16, 128>}, {pipeline_mode = #tpu.pipeline_mode<synchronous>, transform_indices = @transform_1, window_bounds = array<i64: 128, 128>}, {pipeline_mode = #tpu.pipeline_mode<synchronous>, transform_indices = @transform_2, window_bounds = array<i64: 128, 128>}, {pipeline_mode = #tpu.pipeline_mode<synchronous>, transform_indices = @transform_3, window_bounds = array<i64: 1, 128>}, {pipeline_mode = #tpu.pipeline_mode<synchronous>, transform_indices = @transform_4, window_bounds = array<i64: 1, 128>}, {transform_indices = @transform_5, window_bounds = array<i64: 16, 128>}, {transform_indices = @transform_6, window_bounds = array<i64: 16, 1>}]} {
    %c0 = arith.constant 0 : index
    %c0_0 = arith.constant 0 : index
    %0 = vector.load %arg1[%c0, %c0_0] : memref<16x128xbf16, #tpu.memory_space<vmem>>, vector<16x128xbf16>
    %1 = arith.extf %0 : vector<16x128xbf16> to vector<16x128xf32>
    %c0_1 = arith.constant 0 : index
    %c0_2 = arith.constant 0 : index
    %2 = vector.load %arg3[%c0_1, %c0_2] : memref<128x128xbf16, #tpu.memory_space<vmem>>, vector<128x128xbf16>
    %cst = arith.constant dense<0.000000e+00> : vector<16x128xf32>
    %3 = tpu.matmul %0, %2, %cst {dimension_numbers = #tpu.dot_dimension_numbers<[1], [0], [0], [1], [0, 0, 1, 1], [], []>} : vector<16x128xbf16>, vector<128x128xbf16>, vector<16x128xf32> -> vector<16x128xf32>
    %c0_3 = arith.constant 0 : index
    %c0_4 = arith.constant 0 : index
    %4 = vector.load %arg4[%c0_3, %c0_4] : memref<1x128xf32, #tpu.memory_space<vmem>>, vector<1x128xf32>
    %5 = vector.broadcast %4 : vector<1x128xf32> to vector<16x128xf32>
    %6 = arith.addf %3, %5 : vector<16x128xf32>
    %cst_5 = arith.constant 0.000000e+00 : f32
    %7 = vector.broadcast %cst_5 : f32 to vector<16x128xf32>
    %8 = arith.maximumf %6, %7 : vector<16x128xf32>
    %9 = arith.addf %1, %8 : vector<16x128xf32>
    %10 = arith.truncf %9 : vector<16x128xf32> to vector<16x128xbf16>
    %c0_6 = arith.constant 0 : index
    %c0_7 = arith.constant 0 : index
    %11 = vector.load %arg2[%c0_6, %c0_7] : memref<128x128xbf16, #tpu.memory_space<vmem>>, vector<128x128xbf16>
    %cst_8 = arith.constant dense<0.000000e+00> : vector<16x128xf32>
    %12 = tpu.matmul %10, %11, %cst_8 {dimension_numbers = #tpu.dot_dimension_numbers<[1], [0], [0], [1], [0, 0, 1, 1], [], []>} : vector<16x128xbf16>, vector<128x128xbf16>, vector<16x128xf32> -> vector<16x128xf32>
    %c0_9 = arith.constant 0 : index
    %c0_10 = arith.constant 0 : index
    %13 = vector.load %arg6[%c0_9, %c0_10] : memref<16x128xf32, #tpu.memory_space<vmem>>, vector<16x128xf32>
    tpu.vector_store %arg6[%c0_9, %c0_10], %12 {strides = array<i32>} : memref<16x128xf32, #tpu.memory_space<vmem>>, vector<16x128xf32>,
    %c0_11 = arith.constant 0 : index
    %c0_12 = arith.constant 0 : index
    %14 = vector.load %arg5[%c0_11, %c0_12] : memref<1x128xf32, #tpu.memory_space<vmem>>, vector<1x128xf32>
    %15 = vector.broadcast %14 : vector<1x128xf32> to vector<16x128xf32>
    %16 = arith.addf %12, %15 : vector<16x128xf32>
    %cst_13 = arith.constant dense<0xFF800000> : vector<16xf32>
    %17 = vector.multi_reduction <maximumf>, %16, %cst_13 [1] : vector<16x128xf32> to vector<16xf32>
    %18 = vector.shape_cast %17 : vector<16xf32> to vector<16x1xf32>
    %19 = vector.broadcast %18 : vector<16x1xf32> to vector<16x128xf32>
    %20 = arith.subf %16, %19 : vector<16x128xf32>
    %21 = math.exp %20 : vector<16x128xf32>
    %cst_14 = arith.constant dense<0.000000e+00> : vector<16xf32>
    %22 = vector.multi_reduction <add>, %21, %cst_14 [1] : vector<16x128xf32> to vector<16xf32>
    %23 = vector.shape_cast %22 : vector<16xf32> to vector<16x1xf32>
    %24 = math.log %23 : vector<16x1xf32>
    %25 = arith.addf %18, %24 : vector<16x1xf32>
    %26 = arith.extf %10 : vector<16x128xbf16> to vector<16x128xf32>
    %27 = arith.mulf %26, %1 : vector<16x128xf32>
    %cst_15 = arith.constant dense<0.000000e+00> : vector<16xf32>
    %28 = vector.multi_reduction <add>, %27, %cst_15 [1] : vector<16x128xf32> to vector<16xf32>
    %29 = vector.shape_cast %28 : vector<16xf32> to vector<16x1xf32>
    %30 = arith.subf %25, %29 : vector<16x1xf32>
    %c0_16 = arith.constant 0 : index
    %c0_17 = arith.constant 0 : index
    %31 = vector.load %arg7[%c0_16, %c0_17] : memref<16x1xf32, #tpu.memory_space<vmem>>, vector<16x1xf32>
    tpu.vector_store %arg7[%c0_16, %c0_17], %30 {strides = array<i32>} : memref<16x1xf32, #tpu.memory_space<vmem>>, vector<16x1xf32>,
    return
  }
  func.func @transform_0(%arg0: i32) -> (i32, i32) {
    %c0_i32 = arith.constant 0 : i32
    %c0_i32_0 = arith.constant 0 : i32
    return %arg0, %c0_i32 : i32, i32
  }
  func.func @transform_1(%arg0: i32) -> (i32, i32) {
    %c0_i32 = arith.constant 0 : i32
    %c0_i32_0 = arith.constant 0 : i32
    %c0_i32_1 = arith.constant 0 : i32
    return %c0_i32, %c0_i32_0 : i32, i32
  }
  func.func @transform_2(%arg0: i32) -> (i32, i32) {
    %c0_i32 = arith.constant 0 : i32
    %c0_i32_0 = arith.constant 0 : i32
    %c0_i32_1 = arith.constant 0 : i32
    return %c0_i32, %c0_i32_0 : i32, i32
  }
  func.func @transform_3(%arg0: i32) -> (i32, i32) {
    %c0_i32 = arith.constant 0 : i32
    %c0_i32_0 = arith.constant 0 : i32
    %c0_i32_1 = arith.constant 0 : i32
    return %c0_i32, %c0_i32_0 : i32, i32
  }
  func.func @transform_4(%arg0: i32) -> (i32, i32) {
    %c0_i32 = arith.constant 0 : i32
    %c0_i32_0 = arith.constant 0 : i32
    %c0_i32_1 = arith.constant 0 : i32
    return %c0_i32, %c0_i32_0 : i32, i32
  }
  func.func @transform_5(%arg0: i32) -> (i32, i32) {
    %c0_i32 = arith.constant 0 : i32
    %c0_i32_0 = arith.constant 0 : i32
    return %arg0, %c0_i32 : i32, i32
  }
  func.func @transform_6(%arg0: i32) -> (i32, i32) {
    %c0_i32 = arith.constant 0 : i32
    %c0_i32_0 = arith.constant 0 : i32
    return %arg0, %c0_i32 : i32, i32
  }
}

</mosaic_0001>

<bundles_post_ra>
// kernel: tpu_custom_call.1
= control target key start
LH: loop header
LB: loop body
LE: loop exit
PB: predicated region body
PF: predicated region fallthrough
CT: control target
= control target key end

     0   :  { %12 = vsyncpa [#allocation3], 0  ;;  %s691_s0 = inlined_call_operand.hbm [shape: bf16[16,128], index: 0, kind: input, shape index: {}]   ;;  %s692_s1 = inlined_call_operand.hbm [shape: bf16[128,128], index: 1, kind: input, shape index: {}]   ;;  %s693_s2 = inlined_call_operand.hbm [shape: bf16[128,128], index: 2, kind: input, shape index: {}]   ;;  %s694_s3 = inlined_call_operand.vmem [shape: f32[1,128], index: 3, kind: input, shape index: {}]   ;;  %s695_s4 = inlined_call_operand.vmem [shape: f32[1,128], index: 4, kind: input, shape index: {}]   ;;  %s696_s5 = inlined_call_operand.hbm [shape: f32[16,128], index: 5, kind: output, shape index: {0}]   ;;  %s697_s6 = inlined_call_operand.vmem [shape: f32[16,1], index: 6, kind: output, shape index: {1}]  }
   0x1   :  { %13 = vsyncpa [#allocation6], 0 }
   0x2   :  { %14 = vsyncpa [#allocation4], 0  ;;  %s570_s21 = smov [#allocation5]   ;;  %s571_s23 = smov [#allocation2]  }
   0x3   :  { %s32_s22 = sshll.u32 %s570_s21, 4  ;;  %s20_s24 = sshll.u32 %s571_s23, 4  ;;  %s33_s22 = int_to_ptr.vmem [resolvable:$true] %s32_s22  ;;  %s615_s24 = int_to_ptr.vmem [resolvable:$true] %s20_s24 }
   0x4   :  { %s476_s27 = scalar_lea.hbm %s692_s1, 1024 }
   0x5   :  { %p477_p0 = scmp.ne.s32.totalorder %s692_s1, %s476_s27  ;;  %p480_p1 = scmp.lt.u32.totalorder %s476_s27, %s692_s1 }
   0x7   :  { %p482_p2 = pnand %p480_p1, %p477_p0 }
   0x9   :  { %485 = shalt.err (!%p482_p2)
}
   0xa   :  { %s486_s8 = scalar_lea.vmem %s33_s22, 1024  ;;  %p491_p4 = scmp.lt.s32.totalorder %s33_s22, %s33_s22 }
   0xb   :  { %p487_p3 = scmp.ne.s32.totalorder %s33_s22, %s486_s8  ;;  %p492_p5 = scmp.lt.s32.totalorder %s486_s8, %s486_s8 }
   0xd   :  { %p493_p6 = por %p492_p5, %p491_p4 }
   0xf   :  { %p494_p7 = pnand %p493_p6, %p487_p3 }
  0x11   :  { %497 = shalt.err (!%p494_p7)
}
  0x12   :  { %s572_s9 = smov 64   ;;  %s573_s10 = smov 4  }
  0x13   :  { %38 = dma.hbm_to_vmem [thread:$0]  %s692_s1, 1024, %s33_s22, [#allocation6], %s572_s9, %s572_s9, %s573_s10  }
  0x14   :  { %s498_s15 = scalar_lea.hbm %s691_s0, 128 }
  0x15   :  { %p499_p8 = scmp.ne.s32.totalorder %s691_s0, %s498_s15  ;;  %p502_p9 = scmp.lt.u32.totalorder %s498_s15, %s691_s0 }
  0x17   :  { %p504_p10 = pnand %p502_p9, %p499_p8 }
  0x19   :  { %507 = shalt.err (!%p504_p10)
}
  0x1a   :  { %s508_s20 = scalar_lea.vmem %s615_s24, 128  ;;  %p513_p12 = scmp.lt.s32.totalorder %s615_s24, %s615_s24 }
  0x1b   :  { %p509_p11 = scmp.ne.s32.totalorder %s615_s24, %s508_s20  ;;  %p514_p13 = scmp.lt.s32.totalorder %s508_s20, %s508_s20 }
  0x1d   :  { %p515_p0 = por %p514_p13, %p513_p12 }
  0x1f   :  { %p516_p1 = pnand %p515_p0, %p509_p11 }
  0x21   :  { %519 = shalt.err (!%p516_p1)
}
  0x22   :  { %26 = dma.hbm_to_vmem [thread:$0]  %s691_s0, 128, %s615_s24, [#allocation3], %s572_s9, %s572_s9, %s573_s10  }
  0x23   :  { %s574_s22 = smov [#allocation7]   ;;  %s520_s27 = scalar_lea.hbm %s693_s2, 1024 }
  0x24   :  { %s44_s23 = sshll.u32 %s574_s22, 4  ;;  %p521_p2 = scmp.ne.s32.totalorder %s693_s2, %s520_s27  ;;  %s45_s23 = int_to_ptr.vmem [resolvable:$true] %s44_s23 }
  0x25   :  { %p524_p3 = scmp.lt.u32.totalorder %s520_s27, %s693_s2 }
  0x27   :  { %p526_p4 = pnand %p524_p3, %p521_p2 }
  0x29   :  { %529 = shalt.err (!%p526_p4)
}
  0x2a   :  { %s530_s8 = scalar_lea.vmem %s45_s23, 1024  ;;  %p535_p6 = scmp.lt.s32.totalorder %s45_s23, %s45_s23 }
  0x2b   :  { %p531_p5 = scmp.ne.s32.totalorder %s45_s23, %s530_s8  ;;  %p536_p7 = scmp.lt.s32.totalorder %s530_s8, %s530_s8 }
  0x2d   :  { %p537_p8 = por %p536_p7, %p535_p6 }
  0x2f   :  { %p538_p9 = pnand %p537_p8, %p531_p5 }
  0x31   :  { %541 = shalt.err (!%p538_p9)
}
  0x32   :  { %50 = dma.hbm_to_vmem [thread:$0]  %s693_s2, 1024, %s45_s23, [#allocation6], %s572_s9, %s572_s9, %s573_s10  }
  0x33   :  { %564 = dma.done.wait [#allocation3], 128  }
  0x34   :  { %565 = vsyncadd [#allocation3], 4294967168 }
  0x35   :  { %566 = dma.done.wait [#allocation6], 2048  }
  0x36   :  { %567 = vsyncadd [#allocation6], 4294965248  ;;  %v575_v0 = vmov 0.0   ;;  %vm576_vm0 = vmmov 0   ;;  %v450_v1 = vld [vmem:[#allocation7] sm:$0xff]   ;;  %v451_v2 = vld [vmem:[#allocation7 + $0x8] sm:$0xff]  }
  0x37   :  { %400 = vmatprep.subr.bf16.mxu0 %v575_v0  ;;  %416 = vmatprep.mubr.msk.bf16.mxu0 %vm576_vm0, %v575_v0  ;;  %v452_v3 = vld [vmem:[#allocation7 + $0x10] sm:$0xff]   ;;  %v459_v4 = vld [vmem:[#allocation5] sm:$0xff]   ;;  %v453_v5 = vld [vmem:[#allocation7 + $0x18] sm:$0xff]  }
  0x38   :  { %420 = vmatprep.subr.bf16.mxu1 %v575_v0  ;;  %436 = vmatprep.mubr.msk.bf16.mxu1 %vm576_vm0, %v575_v0  ;;  %v460_v6 = vld [vmem:[#allocation5 + $0x8] sm:$0xff]   ;;  %v454_v7 = vld [vmem:[#allocation7 + $0x20] sm:$0xff]   ;;  %v461_v8 = vld [vmem:[#allocation5 + $0x10] sm:$0xff]  }
  0x39   :  { %401 = vmatpush3.bf16.msra.mxu0 %v450_v1  ;;  %421 = vmatpush3.bf16.msra.mxu1 %v459_v4  ;;  %v455_v9 = vld [vmem:[#allocation7 + $0x28] sm:$0xff]   ;;  %v462_v10 = vld [vmem:[#allocation5 + $0x18] sm:$0xff]   ;;  %v456_v11 = vld [vmem:[#allocation7 + $0x30] sm:$0xff]  }
  0x3a   :  { %402 = vmatprep.subr.bf16.mxu0 %v575_v0  ;;  %422 = vmatprep.subr.bf16.mxu1 %v575_v0  ;;  %v463_v12 = vld [vmem:[#allocation5 + $0x20] sm:$0xff]   ;;  %v457_v13 = vld [vmem:[#allocation7 + $0x38] sm:$0xff]   ;;  %v464_v15 = vld [vmem:[#allocation5 + $0x28] sm:$0xff]  }
  0x3b   :  { %v65_v14 = vld [vmem:[#allocation2] sm:$0xff]   ;;  %v465_v16 = vld [vmem:[#allocation5 + $0x30] sm:$0xff]  }
  0x3c   :  { %v466_v17 = vld [vmem:[#allocation5 + $0x38] sm:$0xff]   ;;  %v67_v23 = vunpack.c.l.bf16 %v65_v14  ;;  %v68_v25 = vunpack.c.h.bf16 %v65_v14 }
  0x3d   :  { %403 = vmatpush3.bf16.msra.mxu0 %v451_v2  ;;  %423 = vmatpush3.bf16.msra.mxu1 %v460_v6  ;;  %v363_v18 = vld [vmem:[%s694_s3] ss:$0 sm:$0xff] }
  0x3e   :  { %404 = vmatprep.subr.bf16.mxu0 %v575_v0  ;;  %424 = vmatprep.subr.bf16.mxu1 %v575_v0  ;;  %v381_v36 = vld [vmem:[%s695_s4] ss:$0 sm:$0xff]  ;;  %s577_s4 = smov [#allocation8]  }
  0x3f   :  { %s346_s11 = sshll.u32 %s577_s4, 4  ;;  %s347_s11 = int_to_ptr.vmem [resolvable:$true] %s346_s11 }
  0x40   :  { %s542_s12 = scalar_lea.vmem %s347_s11, 256  ;;  %p547_p11 = scmp.lt.s32.totalorder %s347_s11, %s347_s11 }
  0x41   :  { %405 = vmatpush3.bf16.msra.mxu0 %v452_v3  ;;  %425 = vmatpush3.bf16.msra.mxu1 %v461_v8  ;;  %p543_p10 = scmp.ne.s32.totalorder %s347_s11, %s542_s12  ;;  %p548_p12 = scmp.lt.s32.totalorder %s542_s12, %s542_s12 }
  0x42   :  { %406 = vmatprep.subr.bf16.mxu0 %v575_v0  ;;  %426 = vmatprep.subr.bf16.mxu1 %v575_v0 }
  0x43   :  { %p549_p13 = por %p548_p12, %p547_p11 }
  0x45   :  { %407 = vmatpush3.bf16.msra.mxu0 %v453_v5  ;;  %427 = vmatpush3.bf16.msra.mxu1 %v462_v10  ;;  %p550_p0 = pnand %p549_p13, %p543_p10 }
  0x46   :  { %408 = vmatprep.subr.bf16.mxu0 %v575_v0  ;;  %428 = vmatprep.subr.bf16.mxu1 %v575_v0 }
  0x49   :  { %409 = vmatpush3.bf16.msra.mxu0 %v454_v7  ;;  %429 = vmatpush3.bf16.msra.mxu1 %v463_v12 }
  0x4a   :  { %410 = vmatprep.subr.bf16.mxu0 %v575_v0  ;;  %430 = vmatprep.subr.bf16.mxu1 %v575_v0 }
  0x4d   :  { %411 = vmatpush3.bf16.msra.mxu0 %v455_v9  ;;  %431 = vmatpush3.bf16.msra.mxu1 %v464_v15 }
  0x4e   :  { %412 = vmatprep.subr.bf16.mxu0 %v575_v0  ;;  %432 = vmatprep.subr.bf16.mxu1 %v575_v0 }
  0x51   :  { %413 = vmatpush3.bf16.msra.mxu0 %v456_v11  ;;  %433 = vmatpush3.bf16.msra.mxu1 %v465_v16 }
  0x52   :  { %414 = vmatprep.subr.bf16.mxu0 %v575_v0  ;;  %434 = vmatprep.subr.bf16.mxu1 %v575_v0 }
  0x55   :  { %415 = vmatpush3.bf16.msra.mxu0 %v457_v13  ;;  %435 = vmatpush3.bf16.msra.mxu1 %v466_v17 }
  0x58   :  { %417 = vmatmul.mubr.bf16.vlgmr.msra.gmra.mrb[0].mxu0 %v65_v14 }
 0x12b   :  { %v180_v19 = vpop.f32.mrb[0].mxu0 }
 0x12c   :  { %v181_v20 = vadd.f32 %v363_v18, %v180_v19  ;;  %v418_v21 = vpop.f32.mrb[1].mxu0 }
 0x12d   :  { %v183_v22 = vpop.f32.mrb[2].mxu0 }
 0x12e   :  { %v187_v24 = vmax.f32 %v181_v20, 0.0  ;;  %v184_v26 = vadd.f32 %v363_v18, %v183_v22  ;;  %v419_v27 = vpop.f32.mrb[3].mxu0 }
 0x130   :  { %v188_v28 = vmax.f32 %v184_v26, 0.0  ;;  %v189_v29 = vadd.f32 %v187_v24, %v67_v23 }
 0x132   :  { %v190_v30 = vadd.f32 %v188_v28, %v68_v25 }
 0x134   :  { %v191_v31 = vpack.c.bf16 %v190_v30, %v189_v29 }
 0x136   :  { %437 = vmatmul.mubr.bf16.vlgmr.msra.gmra.mrb[0].mxu1 %v191_v31  ;;  %v328_v32 = vunpack.c.l.bf16 %v191_v31  ;;  %v329_v33 = vunpack.c.h.bf16 %v191_v31 }
 0x138   :  { %v330_v34 = vmul.f32 %v328_v32, %v67_v23  ;;  %v331_v35 = vmul.f32 %v329_v33, %v68_v25 }
 0x209   :  { %v290_v37 = vpop.f32.mrb[0].mxu1 }
 0x20a   :  { %297 = vst [vmem:[#allocation8] sm:$0xff] %v290_v37  ;;  %v438_v38 = vpop.f32.mrb[1].mxu1  ;;  %v306_v39 = vadd.f32 %v381_v36, %v290_v37 }
 0x20b   :  { %v293_v40 = vpop.f32.mrb[2].mxu1 }
 0x20c   :  { %298 = vst [vmem:[#allocation8 + $0x8] sm:$0xff] %v293_v40  ;;  %308 = vmax.xlane.f32.xlu0 %v306_v39  ;;  %v439_v41 = vpop.f32.mrb[3].mxu1  ;;  %v307_v42 = vadd.f32 %v381_v36, %v293_v40 }
 0x210   :  { %310 = vmax.xlane.f32.xlu0 %v307_v42 }
 0x214   :  { %332 = vadd.xlane.f32.xlu0 %v330_v34 }
 0x299   :  { %v309_v43 = vpop.xlane.xlu0 %308 }
 0x29a   :  { %v312_v44 = vsub.f32 %v306_v39, %v309_v43 }
 0x29c   :  { %v314_v45 = vmul.f32 1.442695, %v312_v44 }
 0x29d   :  { %v311_v46 = vpop.xlane.xlu0 %310 }
 0x29e   :  { %v313_v47 = vsub.f32 %v307_v42, %v311_v46  ;;  %468 = vpow2.f32 %v314_v45 }
 0x2a0   :  { %v316_v48 = vmul.f32 1.442695, %v313_v47 }
 0x2a2   :  { %470 = vpow2.f32 %v316_v48 }
 0x2a8   :  { %v469_v49 = vpop.eup %468 }
 0x2a9   :  { %318 = vadd.xlane.f32.xlu1 %v469_v49 }
 0x2ac   :  { %v471_v50 = vpop.eup %470 }
 0x2ad   :  { %320 = vadd.xlane.f32.xlu1 %v471_v50 }
 0x2b1   :  { %334 = vadd.xlane.f32.xlu1 %v331_v35 }
 0x2b2   :  { %553 = shalt.err (!%p550_p0)
}
 0x2b3   :  { %s554_s15 = scalar_lea.hbm %s696_s5, 256 }
 0x2b4   :  { %p555_p1 = scmp.ne.s32.totalorder %s696_s5, %s554_s15  ;;  %p558_p2 = scmp.lt.u32.totalorder %s554_s15, %s696_s5 }
 0x2b6   :  { %p560_p3 = pnand %p558_p2, %p555_p1 }
 0x2b8   :  { %563 = shalt.err (!%p560_p3)
}
 0x2b9   :  { %s578_s20 = smov 128   ;;  %s579_s1 = smov 8   ;;  %v333_v57 = vpop.xlane.xlu0 %332  ;;  %vm338_vm1 = vcmask 7168  }
 0x2ba   :  { %352 = dma.vmem_to_hbm [thread:$0]  %s347_s11, 256, %s696_s5, [#allocation4], %s578_s20, %s578_s20, %s579_s1  }
 0x336   :  { %v319_v51 = vpop.xlane.xlu1 %318 }
 0x337   :  { %472 = vlog2.f32 %v319_v51 }
 0x33a   :  { %v321_v52 = vpop.xlane.xlu1 %320 }
 0x33b   :  { %474 = vlog2.f32 %v321_v52 }
 0x33e   :  { %v335_v61 = vpop.xlane.xlu1 %334 }
 0x341   :  { %v473_v53 = vpop.eup %472 }
 0x342   :  { %v323_v54 = vmul.f32 0.6931472, %v473_v53 }
 0x344   :  { %v326_v55 = vadd.f32 %v323_v54, %v309_v43 }
 0x345   :  { %v475_v56 = vpop.eup %474 }
 0x346   :  { %v336_v58 = vsub.f32 %v326_v55, %v333_v57  ;;  %v325_v59 = vmul.f32 0.6931472, %v475_v56 }
 0x348   :  { %v327_v60 = vadd.f32 %v325_v59, %v311_v46  ;;  %339 = vst.msk [vmem:[%s697_s6] sm:$0xff] %vm338_vm1, %v336_v58 }
 0x34a   :  { %v337_v62 = vsub.f32 %v327_v60, %v335_v61 }
 0x34c   :  { %340 = vst.msk [vmem:[%s697_s6 + $0x8] sm:$0xff] %vm338_vm1, %v337_v62 }
 0x34d   :  { %568 = dma.done.wait [#allocation4], 256  }
 0x34e   :  { %569 = vsyncadd [#allocation4], 4294967040 }
 0x34f   :  { %360 = vsyncpa [#allocation3], 1 }
 0x350   :  { %361 = vsyncpa [#allocation6], 1 }
 0x351   :  { %362 = vsyncpa [#allocation4], 1 }

</bundles_post_ra>
